<compile_context>
chip_gen: v5e
topology: v5e:2x2
jax: 0.10.0
libtpu: 0.0.40
codegen_flags: <defaults>
</compile_context>

<pallas_src>
import jax
import jax.numpy as jnp
from jax.experimental import pallas as pl
from jax.experimental.pallas import tpu as pltpu


def _round_up(x, m):
    return ((x + m - 1) // m) * m


def _cdiv(a, b):
    return (a + b - 1) // b


def _pick_tile(n, cap, align=8):
    """Largest tile <= cap that is a multiple of `align`, or the full dim if n <= align."""
    if n <= align:
        return n
    t = min(cap, n)
    return max(align, (t // align) * align)


def _vmem_capacity_bytes():
    try:
        return int(pltpu.get_tpu_info().vmem_capacity_bytes)
    except Exception:
        return 64 * 2**20  # conservative: v7x per-TensorCore VMEM


def _joint_kernel(enc_ref, dec_ref, we_ref, be_ref, wd_ref, wo_ref, bo_ref,
                  out_ref, encp_ref, z_ref):
    """One (batch, T-tile, U-tile, D_out-tile) grid step.

    enc_ref:  (1, Tt, D_enc_p) compute_dtype   dec_ref: (1, Ut, D_dec_p) compute_dtype
    we_ref:   (D_enc_p, Jp)    compute_dtype   be_ref:  (1, Jp)  f32
    wd_ref:   (D_dec_p, Jp)    compute_dtype
    wo_ref:   (Jp, TDo)        compute_dtype   bo_ref:  (1, TDo) f32
    out_ref:  (1, Tt, Ut, TDo) out_dtype
    encp_ref: (Tt, Jp)      VMEM scratch — encoder projection, cached per T-tile.
    z_ref:    (Tt*Ut, Jp)   VMEM scratch — tanh(enc_p+dec_p), cached per U-tile.

    NOTE: encp_ref carries across the (U, D_out) grid axes and z_ref across the
    D_out axis.  This is only correct because those are the two innermost grid
    axes and both are marked "arbitrary" (sequential) — do not reorder the grid
    or change dimension_semantics without updating the pl.when guards.
    """
    ui = pl.program_id(2)
    di = pl.program_id(3)

    # Encoder projection (+ bias): only when a new (b, T-tile) slab starts.
    @pl.when((ui == 0) & (di == 0))
    def _():
        encp = jnp.dot(enc_ref[0], we_ref[...],
                       preferred_element_type=jnp.float32) + be_ref[...]
        encp_ref[...] = encp.astype(encp_ref.dtype)

    # tanh(enc_p + dec_p): only when a new U-tile starts; reused for all D_out tiles.
    @pl.when(di == 0)
    def _():
        dec_p = jnp.dot(dec_ref[0], wd_ref[...],
                        preferred_element_type=jnp.float32).astype(z_ref.dtype)
        enc_p = encp_ref[...]                                   # (Tt, Jp)
        z = jnp.tanh(enc_p[:, None, :] + dec_p[None, :, :])     # (Tt, Ut, Jp)
        z_ref[...] = z.reshape(z_ref.shape)

    # Dominant output matmul for this D_out tile, f32 accumulation + bias.
    out = jnp.dot(z_ref[...], wo_ref[...],
                  preferred_element_type=jnp.float32) + bo_ref[...]
    out_ref[...] = out.reshape(out_ref.shape).astype(out_ref.dtype)


def joint_network_forward(enc_out, dec_out, params, *,
                          compute_dtype=jnp.bfloat16,
                          out_dtype=jnp.float32,
                          tile_t=None, tile_u=None, tile_do=None):
    """Pallas implementation of JointNetwork.forward (default path, tanh act).

    Args:
      enc_out: (B, T, 1, D_enc) float32
      dec_out: (B, 1, U, D_dec) float32
      params: PyTorch-convention weights:
        lin_enc_w (J, D_enc), lin_enc_b (J,)
        lin_dec_w (J, D_dec)
        lin_out_w (D_out, J), lin_out_b (D_out,)
      compute_dtype: dtype for activations/weights and the add+tanh
        (bf16 default; use jnp.float32 for strict parity, e.g. on v5e).
      out_dtype: output dtype (f32 default, matching PyTorch).
    Returns:
      (B, T, U, D_out) out_dtype
    """
    B, T, _, D_enc = enc_out.shape
    _, _, U, D_dec = dec_out.shape

    # Pre-transpose weights to (in, out) for row-major MXU matmuls.
    we = params["lin_enc_w"].T                     # (D_enc, J)
    be = params["lin_enc_b"].reshape(1, -1)        # (1, J)
    wd = params["lin_dec_w"].T                     # (D_dec, J)
    wo = params["lin_out_w"].T                     # (J, D_out)
    bo = params["lin_out_b"].reshape(1, -1)        # (1, D_out)

    J = we.shape[1]
    D_out = wo.shape[1]

    # Lane-dense zero padding of contraction/feature dims only (multiples of 128).
    D_enc_p = _round_up(D_enc, 128)
    D_dec_p = _round_up(D_dec, 128)
    Jp = _round_up(J, 128)

    c_size = jnp.dtype(compute_dtype).itemsize
    o_size = jnp.dtype(out_dtype).itemsize

    # D_out tile: stream large vocabularies; a single full-extent tile when small
    # (block == full dim is always layout-legal).
    if tile_do is not None:
        TDo = tile_do
    elif D_out <= 512:
        TDo = D_out
    else:
        TDo = 512

    weight_vmem = (2 * (D_enc_p + D_dec_p) * Jp * c_size   # we / wd (double-buffered)
                   + 2 * Jp * TDo * c_size                 # wo tile
                   + 2 * (Jp + TDo) * 4)                   # biases
    vmem_cap = _vmem_capacity_bytes()
    budget = max(8 * 2**20, vmem_cap // 2 - weight_vmem)

    Tt = tile_t if tile_t is not None else _pick_tile(T, 128)
    Ut = tile_u if tile_u is not None else _pick_tile(U, 128)

    def footprint(tt, ut):
        return (2 * tt * ut * TDo * o_size        # output block (double-buffered)
                + 2 * tt * D_enc_p * c_size       # enc block
                + 2 * ut * D_dec_p * c_size       # dec block
                + tt * ut * Jp * c_size           # z scratch
                + tt * Jp * c_size)               # enc_p scratch

    if tile_t is None or tile_u is None:
        while footprint(Tt, Ut) > budget and (Tt > 8 or Ut > 8):
            if Ut >= Tt and Ut > 8:
                Ut = max(8, ((Ut // 2) // 8) * 8)
            else:
                Tt = max(8, ((Tt // 2) // 8) * 8)
        # v7x has 2 TensorCores: keep >= 2 units of work on the parallel axes.
        if tile_t is None:
            while B * _cdiv(T, Tt) < 2 and Tt > 8:
                Tt = max(8, ((Tt // 2) // 8) * 8)

    nT, nU, nDo = _cdiv(T, Tt), _cdiv(U, Ut), _cdiv(D_out, TDo)
    grid = (B, nT, nU, nDo)

    # Only feature dims are padded; T / U / D_out stay exact, so the output is
    # written once (no second HBM pass to slice a padded result).
    enc = jnp.pad(enc_out.reshape(B, T, D_enc),
                  ((0, 0), (0, 0), (0, D_enc_p - D_enc))).astype(compute_dtype)
    dec = jnp.pad(dec_out.reshape(B, U, D_dec),
                  ((0, 0), (0, 0), (0, D_dec_p - D_dec))).astype(compute_dtype)
    we_p = jnp.pad(we, ((0, D_enc_p - D_enc), (0, Jp - J))).astype(compute_dtype)
    be_p = jnp.pad(be, ((0, 0), (0, Jp - J))).astype(jnp.float32)
    wd_p = jnp.pad(wd, ((0, D_dec_p - D_dec), (0, Jp - J))).astype(compute_dtype)
    wo_p = jnp.pad(wo, ((0, Jp - J), (0, 0))).astype(compute_dtype)  # zero rows: no effect
    bo_p = bo.astype(jnp.float32)

    vmem_limit = int(min(vmem_cap,
                         max(32 * 2**20,
                             int(1.5 * (footprint(Tt, Ut) + weight_vmem)))))

    # Advisory cost estimate (padded/tiled extents).
    Tp, Up, Dop = nT * Tt, nU * Ut, nDo * TDo
    flops = (2 * B * Tp * D_enc_p * Jp
             + 2 * B * nT * Up * D_dec_p * Jp
             + 2 * B * Tp * Up * Jp * Dop)
    transcendentals = B * Tp * Up * Jp
    wo_stream_factor = (B * nT * nU) if nDo > 1 else 1
    bytes_accessed = (enc.size * c_size + dec.size * c_size
                      + we_p.size * c_size + wd_p.size * c_size
                      + wo_stream_factor * wo_p.size * c_size
                      + be_p.size * 4 + bo_p.size * 4
                      + B * T * U * D_out * o_size)
    cost = pl.CostEstimate(flops=int(flops),
                           transcendentals=int(transcendentals),
                           bytes_accessed=int(bytes_accessed))

    out = pl.pallas_call(
        _joint_kernel,
        out_shape=jax.ShapeDtypeStruct((B, T, U, D_out), out_dtype),
        grid_spec=pltpu.PrefetchScalarGridSpec(
            num_scalar_prefetch=0,
            grid=grid,
            in_specs=[
                pl.BlockSpec((1, Tt, D_enc_p), lambda b, ti, ui, di: (b, ti, 0)),
                pl.BlockSpec((1, Ut, D_dec_p), lambda b, ti, ui, di: (b, ui, 0)),
                pl.BlockSpec((D_enc_p, Jp), lambda b, ti, ui, di: (0, 0)),
                pl.BlockSpec((1, Jp), lambda b, ti, ui, di: (0, 0)),
                pl.BlockSpec((D_dec_p, Jp), lambda b, ti, ui, di: (0, 0)),
                pl.BlockSpec((Jp, TDo), lambda b, ti, ui, di: (0, di)),
                pl.BlockSpec((1, TDo), lambda b, ti, ui, di: (0, di)),
            ],
            out_specs=pl.BlockSpec((1, Tt, Ut, TDo),
                                   lambda b, ti, ui, di: (b, ti, ui, di)),
            scratch_shapes=[
                pltpu.VMEM((Tt, Jp), compute_dtype),       # cached encoder projection
                pltpu.VMEM((Tt * Ut, Jp), compute_dtype),  # cached tanh(z) for D_out tiles
            ],
        ),
        compiler_params=pltpu.CompilerParams(
            dimension_semantics=("parallel", "parallel", "arbitrary", "arbitrary"),
            vmem_limit_bytes=vmem_limit,
        ),
        cost_estimate=cost,
    )(enc, dec, we_p, be_p, wd_p, wo_p, bo_p)

    return out


def init_params(key, joint_output_size, encoder_output_size, decoder_output_size,
                joint_space_size):
    """Deterministic PyTorch-Linear-style init: uniform(-1/sqrt(fan_in), +1/sqrt(fan_in))."""
    k = jax.random.split(key, 5)

    def u(kk, shape, fan_in):
        bound = 1.0 / jnp.sqrt(fan_in)
        return jax.random.uniform(kk, shape, jnp.float32, -bound, bound)

    return {
        "lin_enc_w": u(k[0], (joint_space_size, encoder_output_size), encoder_output_size),
        "lin_enc_b": u(k[1], (joint_space_size,), encoder_output_size),
        "lin_dec_w": u(k[2], (joint_space_size, decoder_output_size), decoder_output_size),
        "lin_out_w": u(k[3], (joint_output_size, joint_space_size), joint_space_size),
        "lin_out_b": u(k[4], (joint_output_size,), joint_space_size),
    }


def _reference(enc_out, dec_out, params):
    """Pure-JAX f32 reference matching the PyTorch forward."""
    enc_p = jnp.einsum("btod,jd->btoj", enc_out, params["lin_enc_w"]) + params["lin_enc_b"]
    dec_p = jnp.einsum("boud,jd->bouj", dec_out, params["lin_dec_w"])
    z = jnp.tanh(enc_p + dec_p)  # (B, T, U, J)
    return jnp.einsum("btuj,oj->btuo", z, params["lin_out_w"]) + params["lin_out_b"]


if __name__ == "__main__":
    # Small shapes consistent with the module's forward signature; chosen so
    # ragged edge blocks on T, U and D_out, the feature-dim padding and the
    # cached-scratch carries are all exercised.
    B, T, U = 2, 20, 12
    D_enc, D_dec, J, D_out = 32, 48, 64, 200

    key = jax.random.PRNGKey(0)
    k_enc, k_dec, k_params = jax.random.split(key, 3)

    enc_out = jax.random.normal(k_enc, (B, T, 1, D_enc), jnp.float32)
    dec_out = jax.random.normal(k_dec, (B, 1, U, D_dec), jnp.float32)

    params = init_params(
        k_params,
        joint_output_size=D_out,
        encoder_output_size=D_enc,
        decoder_output_size=D_dec,
        joint_space_size=J,
    )

    ref = _reference(enc_out, dec_out, params)

    # 1) Forced small tiles -> 4-D grid with ragged edges on T (20/8), U (12/8)
    #    and D_out (200/128); exercises the enc_p carry across (U, D_out) tiles
    #    and the z carry across D_out tiles.
    out1 = joint_network_forward(enc_out, dec_out, params,
                                 tile_t=8, tile_u=8, tile_do=128)
    out1 = jax.block_until_ready(out1)
    assert out1.shape == (B, T, U, D_out), out1.shape
    err1 = float(jnp.max(jnp.abs(out1 - ref)))
    # bf16 compute path (f32 accumulation) => loosened tolerance vs f32 reference.
    assert jnp.allclose(out1, ref, atol=5e-2, rtol=5e-2), err1

    # 2) Auto-derived tiles (bf16 compute path, single D_out tile).
    out2 = joint_network_forward(enc_out, dec_out, params)
    out2 = jax.block_until_ready(out2)
    assert out2.shape == (B, T, U, D_out), out2.shape
    err2 = float(jnp.max(jnp.abs(out2 - ref)))
    assert jnp.allclose(out2, ref, atol=5e-2, rtol=5e-2), err2

    # 3) f32 fallback path (strict parity, e.g. for v5e).
    out3 = joint_network_forward(enc_out, dec_out, params,
                                 compute_dtype=jnp.float32)
    out3 = jax.block_until_ready(out3)
    err3 = float(jnp.max(jnp.abs(out3 - ref)))
    assert jnp.allclose(out3, ref, atol=2e-3, rtol=2e-3), err3

    print("KERNEL_OK")
</pallas_src>

<mosaic_0001>
module attributes {stable_mosaic.version = 11 : i64} {
  func.func @_joint_kernel(%arg0: i32, %arg1: i32, %arg2: i32, %arg3: i32, %arg4: memref<1x8x128xbf16, #tpu.memory_space<vmem>>, %arg5: memref<1x8x128xbf16, #tpu.memory_space<vmem>>, %arg6: memref<128x128xbf16, #tpu.memory_space<vmem>>, %arg7: memref<1x128xf32, #tpu.memory_space<vmem>>, %arg8: memref<128x128xbf16, #tpu.memory_space<vmem>>, %arg9: memref<128x128xbf16, #tpu.memory_space<vmem>>, %arg10: memref<1x128xf32, #tpu.memory_space<vmem>>, %arg11: memref<1x8x8x128xf32, #tpu.memory_space<vmem>>, %arg12: memref<8x128xbf16, #tpu.memory_space<vmem>>, %arg13: memref<64x128xbf16, #tpu.memory_space<vmem>>) attributes {dimension_semantics = [#tpu.dimension_semantics<parallel>, #tpu.dimension_semantics<parallel>, #tpu.dimension_semantics<arbitrary>, #tpu.dimension_semantics<arbitrary>], iteration_bounds = array<i64: 2, 3, 2, 2>, scalar_prefetch = 0 : i64, scratch_operands = 2 : i64, tpu.core_type = #tpu.core_type<tc>, window_params = [{transform_indices = @transform_0, window_bounds = array<i64: 1, 8, 128>}, {transform_indices = @transform_1, window_bounds = array<i64: 1, 8, 128>}, {pipeline_mode = #tpu.pipeline_mode<synchronous>, transform_indices = @transform_2, window_bounds = array<i64: 128, 128>}, {pipeline_mode = #tpu.pipeline_mode<synchronous>, transform_indices = @transform_3, window_bounds = array<i64: 1, 128>}, {pipeline_mode = #tpu.pipeline_mode<synchronous>, transform_indices = @transform_4, window_bounds = array<i64: 128, 128>}, {transform_indices = @transform_5, window_bounds = array<i64: 128, 128>}, {transform_indices = @transform_6, window_bounds = array<i64: 1, 128>}, {transform_indices = @transform_7, window_bounds = array<i64: 1, 8, 8, 128>}]} {
    %c0_i32 = arith.constant 0 : i32
    %0 = arith.cmpi eq, %arg2, %c0_i32 : i32
    %c0_i32_0 = arith.constant 0 : i32
    %1 = arith.cmpi eq, %arg3, %c0_i32_0 : i32
    %2 = arith.andi %0, %1 : i1
    %3 = arith.extui %2 : i1 to i32
    %c0_i32_1 = arith.constant 0 : i32
    %4 = arith.cmpi ne, %3, %c0_i32_1 : i32
    scf.if %4 {
      %c0_13 = arith.constant 0 : index
      %c0_14 = arith.constant 0 : index
      %c0_15 = arith.constant 0 : index
      %16 = vector.load %arg4[%c0_13, %c0_14, %c0_15] : memref<1x8x128xbf16, #tpu.memory_space<vmem>>, vector<1x8x128xbf16>
      %17 = vector.shape_cast %16 : vector<1x8x128xbf16> to vector<8x128xbf16>
      %c0_16 = arith.constant 0 : index
      %c0_17 = arith.constant 0 : index
      %18 = vector.load %arg6[%c0_16, %c0_17] : memref<128x128xbf16, #tpu.memory_space<vmem>>, vector<128x128xbf16>
      %cst_18 = arith.constant dense<0.000000e+00> : vector<8x128xf32>
      %19 = tpu.matmul %17, %18, %cst_18 {dimension_numbers = #tpu.dot_dimension_numbers<[1], [0], [0], [1], [0, 0, 1, 1], [], []>} : vector<8x128xbf16>, vector<128x128xbf16>, vector<8x128xf32> -> vector<8x128xf32>
      %c0_19 = arith.constant 0 : index
      %c0_20 = arith.constant 0 : index
      %20 = vector.load %arg7[%c0_19, %c0_20] : memref<1x128xf32, #tpu.memory_space<vmem>>, vector<1x128xf32>
      %21 = vector.broadcast %20 : vector<1x128xf32> to vector<8x128xf32>
      %22 = arith.addf %19, %21 : vector<8x128xf32>
      %23 = arith.truncf %22 : vector<8x128xf32> to vector<8x128xbf16>
      %c0_21 = arith.constant 0 : index
      %c0_22 = arith.constant 0 : index
      %24 = vector.load %arg12[%c0_21, %c0_22] : memref<8x128xbf16, #tpu.memory_space<vmem>>, vector<8x128xbf16>
      tpu.vector_store %arg12[%c0_21, %c0_22], %23 {strides = array<i32>} : memref<8x128xbf16, #tpu.memory_space<vmem>>, vector<8x128xbf16>,
    } else {
    }
    %c0_i32_2 = arith.constant 0 : i32
    %5 = arith.cmpi eq, %arg3, %c0_i32_2 : i32
    %6 = arith.extui %5 : i1 to i32
    %c0_i32_3 = arith.constant 0 : i32
    %7 = arith.cmpi ne, %6, %c0_i32_3 : i32
    scf.if %7 {
      %c0_13 = arith.constant 0 : index
      %c0_14 = arith.constant 0 : index
      %c0_15 = arith.constant 0 : index
      %16 = vector.load %arg5[%c0_13, %c0_14, %c0_15] : memref<1x8x128xbf16, #tpu.memory_space<vmem>>, vector<1x8x128xbf16>
      %17 = vector.shape_cast %16 : vector<1x8x128xbf16> to vector<8x128xbf16>
      %c0_16 = arith.constant 0 : index
      %c0_17 = arith.constant 0 : index
      %18 = vector.load %arg8[%c0_16, %c0_17] : memref<128x128xbf16, #tpu.memory_space<vmem>>, vector<128x128xbf16>
      %cst_18 = arith.constant dense<0.000000e+00> : vector<8x128xf32>
      %19 = tpu.matmul %17, %18, %cst_18 {dimension_numbers = #tpu.dot_dimension_numbers<[1], [0], [0], [1], [0, 0, 1, 1], [], []>} : vector<8x128xbf16>, vector<128x128xbf16>, vector<8x128xf32> -> vector<8x128xf32>
      %20 = arith.truncf %19 : vector<8x128xf32> to vector<8x128xbf16>
      %c0_19 = arith.constant 0 : index
      %c0_20 = arith.constant 0 : index
      %21 = vector.load %arg12[%c0_19, %c0_20] : memref<8x128xbf16, #tpu.memory_space<vmem>>, vector<8x128xbf16>
      %22 = vector.shape_cast %21 : vector<8x128xbf16> to vector<8x1x128xbf16>
      %23 = vector.shape_cast %20 : vector<8x128xbf16> to vector<1x8x128xbf16>
      %24 = vector.broadcast %22 : vector<8x1x128xbf16> to vector<8x8x128xbf16>
      %25 = vector.broadcast %23 : vector<1x8x128xbf16> to vector<8x8x128xbf16>
      %26 = arith.addf %24, %25 : vector<8x8x128xbf16>
      %27 = math.tanh %26 : vector<8x8x128xbf16>
      %28 = vector.shape_cast %27 : vector<8x8x128xbf16> to vector<64x128xbf16>
      %c0_21 = arith.constant 0 : index
      %c0_22 = arith.constant 0 : index
      %29 = vector.load %arg13[%c0_21, %c0_22] : memref<64x128xbf16, #tpu.memory_space<vmem>>, vector<64x128xbf16>
      tpu.vector_store %arg13[%c0_21, %c0_22], %28 {strides = array<i32>} : memref<64x128xbf16, #tpu.memory_space<vmem>>, vector<64x128xbf16>,
    } else {
    }
    %c0 = arith.constant 0 : index
    %c0_4 = arith.constant 0 : index
    %8 = vector.load %arg13[%c0, %c0_4] : memref<64x128xbf16, #tpu.memory_space<vmem>>, vector<64x128xbf16>
    %c0_5 = arith.constant 0 : index
    %c0_6 = arith.constant 0 : index
    %9 = vector.load %arg9[%c0_5, %c0_6] : memref<128x128xbf16, #tpu.memory_space<vmem>>, vector<128x128xbf16>
    %cst = arith.constant dense<0.000000e+00> : vector<64x128xf32>
    %10 = tpu.matmul %8, %9, %cst {dimension_numbers = #tpu.dot_dimension_numbers<[1], [0], [0], [1], [0, 0, 1, 1], [], []>} : vector<64x128xbf16>, vector<128x128xbf16>, vector<64x128xf32> -> vector<64x128xf32>
    %c0_7 = arith.constant 0 : index
    %c0_8 = arith.constant 0 : index
    %11 = vector.load %arg10[%c0_7, %c0_8] : memref<1x128xf32, #tpu.memory_space<vmem>>, vector<1x128xf32>
    %12 = vector.broadcast %11 : vector<1x128xf32> to vector<64x128xf32>
    %13 = arith.addf %10, %12 : vector<64x128xf32>
    %14 = vector.shape_cast %13 : vector<64x128xf32> to vector<1x8x8x128xf32>
    %c0_9 = arith.constant 0 : index
    %c0_10 = arith.constant 0 : index
    %c0_11 = arith.constant 0 : index
    %c0_12 = arith.constant 0 : index
    %15 = vector.load %arg11[%c0_9, %c0_10, %c0_11, %c0_12] : memref<1x8x8x128xf32, #tpu.memory_space<vmem>>, vector<1x8x8x128xf32>
    tpu.vector_store %arg11[%c0_9, %c0_10, %c0_11, %c0_12], %14 {strides = array<i32>} : memref<1x8x8x128xf32, #tpu.memory_space<vmem>>, vector<1x8x8x128xf32>,
    return
  }
  func.func @transform_0(%arg0: i32, %arg1: i32, %arg2: i32, %arg3: i32) -> (i32, i32, i32) {
    %c0_i32 = arith.constant 0 : i32
    %c0_i32_0 = arith.constant 0 : i32
    return %arg0, %arg1, %c0_i32 : i32, i32, i32
  }
  func.func @transform_1(%arg0: i32, %arg1: i32, %arg2: i32, %arg3: i32) -> (i32, i32, i32) {
    %c0_i32 = arith.constant 0 : i32
    %c0_i32_0 = arith.constant 0 : i32
    return %arg0, %arg2, %c0_i32 : i32, i32, i32
  }
  func.func @transform_2(%arg0: i32, %arg1: i32, %arg2: i32, %arg3: i32) -> (i32, i32) {
    %c0_i32 = arith.constant 0 : i32
    %c0_i32_0 = arith.constant 0 : i32
    %c0_i32_1 = arith.constant 0 : i32
    return %c0_i32, %c0_i32_0 : i32, i32
  }
  func.func @transform_3(%arg0: i32, %arg1: i32, %arg2: i32, %arg3: i32) -> (i32, i32) {
    %c0_i32 = arith.constant 0 : i32
    %c0_i32_0 = arith.constant 0 : i32
    %c0_i32_1 = arith.constant 0 : i32
    return %c0_i32, %c0_i32_0 : i32, i32
  }
  func.func @transform_4(%arg0: i32, %arg1: i32, %arg2: i32, %arg3: i32) -> (i32, i32) {
    %c0_i32 = arith.constant 0 : i32
    %c0_i32_0 = arith.constant 0 : i32
    %c0_i32_1 = arith.constant 0 : i32
    return %c0_i32, %c0_i32_0 : i32, i32
  }
  func.func @transform_5(%arg0: i32, %arg1: i32, %arg2: i32, %arg3: i32) -> (i32, i32) {
    %c0_i32 = arith.constant 0 : i32
    %c0_i32_0 = arith.constant 0 : i32
    return %c0_i32, %arg3 : i32, i32
  }
  func.func @transform_6(%arg0: i32, %arg1: i32, %arg2: i32, %arg3: i32) -> (i32, i32) {
    %c0_i32 = arith.constant 0 : i32
    %c0_i32_0 = arith.constant 0 : i32
    return %c0_i32, %arg3 : i32, i32
  }
  func.func @transform_7(%arg0: i32, %arg1: i32, %arg2: i32, %arg3: i32) -> (i32, i32, i32, i32) {
    %c0_i32 = arith.constant 0 : i32
    return %arg0, %arg1, %arg2, %arg3 : i32, i32, i32, i32
  }
}

</mosaic_0001>

<bundles_post_ra>
// kernel: tpu_custom_call.1
= control target key start
LH: loop header
LB: loop body
LE: loop exit
PB: predicated region body
PF: predicated region fallthrough
CT: control target
= control target key end

     0   :  { %s2234_s0 = inlined_call_operand.vmem [shape: bf16[2,20,128], index: 0, kind: input, shape index: {}]   ;;  %s2235_s1 = inlined_call_operand.vmem [shape: bf16[2,12,128], index: 1, kind: input, shape index: {}]   ;;  %s2236_s2 = inlined_call_operand.vmem [shape: bf16[128,128], index: 2, kind: input, shape index: {}]   ;;  %s2237_s3 = inlined_call_operand.vmem [shape: f32[1,128], index: 3, kind: input, shape index: {}]   ;;  %s2238_s4 = inlined_call_operand.vmem [shape: bf16[128,128], index: 4, kind: input, shape index: {}]   ;;  %s2239_s5 = inlined_call_operand.vmem [shape: bf16[128,200], index: 5, kind: input, shape index: {}]   ;;  %s2240_s6 = inlined_call_operand.vmem [shape: f32[1,200], index: 6, kind: input, shape index: {}]   ;;  %s2241_s7 = inlined_call_operand.vmem [shape: f32[2,20,12,200], index: 7, kind: output, shape index: {}]  }
   0x1   :  { %2250 = sst [smem:[#allocation13_spill]] %s2234_s0 }
   0x2   :  { %2251 = sst [smem:[#allocation14_spill]] %s2236_s2 }
   0x3   :  { %2252 = sst [smem:[#allocation15_spill]] %s2237_s3 }
   0x4   :  { %2253 = sst [smem:[#allocation16_spill]] %s2238_s4 }
   0x5   :  { %2254 = sst [smem:[#allocation17_spill]] %s2239_s5 }
   0x6   :  { %2255 = sst [smem:[#allocation18_spill]] %s2240_s6 }
   0x7   :  { %2256 = sst [smem:[#allocation19_spill]] %s2241_s7 }
   0x8   :  { %s1883_s24 = smov 0   ;;  %s1885_s25 = smov 0  }
   0x9   :  { %s1887_s26 = smov 0   ;;  %s1889_s27 = smov 0  }
   0xa   :  { %s1891_s28 = smov 0   ;;  %s1893_s29 = smov 0  }
   0xb   :  { %s1895_s30 = smov 0   ;;  %s1897_s8 = smov 0  }
   0xc   :  { %s1899_s9 = smov 0   ;;  %s1901_s10 = smov 0  }
   0xd   :  { %s1903_s11 = smov 0   ;;  %s1905_s12 = smov 0  }
   0xe   :  { %s1907_s13 = smov 0  }
   0xf LB: > { %2257 = sst [smem:[#allocation6_spill]] %s1801_s11  ;;  %s32_s14 = sadd.s32 1, %s1793_s9  ;;  %s1809_s13 = sphi %s1907_s13, %s17_s13   ;;  %s1805_s12 = sphi %s1905_s12, %s2286_s12   ;;  %s1801_s11 = sphi %s1903_s11, %s2285_s11   ;;  %s1797_s10 = sphi %s1901_s10, %s2294_s10   ;;  %s1793_s9 = sphi %s1899_s9, %s2293_s9   ;;  %s1789_s8 = sphi %s1897_s8, %s2282_s8   ;;  %s1785_s30 = sphi %s1895_s30, %s2281_s30   ;;  %s1781_s29 = sphi %s1893_s29, %s2292_s29   ;;  %s1777_s28 = sphi %s1891_s28, %s2291_s28   ;;  %s1773_s27 = sphi %s1889_s27, %s2290_s27   ;;  %s1769_s26 = sphi %s1887_s26, %s2289_s26   ;;  %s1765_s25 = sphi %s1885_s25, %s2288_s25   ;;  %s1761_s24 = sphi %s1883_s24, %s2287_s24  }
  0x10   : > { %2258 = sst [smem:[#allocation7_spill]] %s1805_s12  ;;  %p33_p0 = scmp.ge.s32.totalorder %s32_s14, 2 }
  0x11   : > { %s35_s15 = sadd.s32 1, %s1797_s10  ;;  %s39_s16 = sadd.s32 1, %s1801_s11 }
  0x12   : > { %s2296_s14 = smov (%p33_p0, %s32_s14), 0  ;;  %s2298_s15 = smov (!%p33_p0, %s35_s15), %s1797_s10 }
  0x13   : > { %2259 = sst [smem:[#allocation8_spill]] %s2296_s14  ;;  %s166_s17 = ssub.s32 %s1793_s9, %s2296_s14 }
  0x14   : > { %s169_s18 = sadd.s32 1, %s1773_s27  ;;  %p37_p1 = scmp.ge.s32.totalorder %s2298_s15, 2 }
  0x15   : > { %p167_p2 = scmp.eq.s32.totalorder %s166_s17, 0  ;;  %p176_p3 = scmp.ne.s32.totalorder %s1773_s27, %s1769_s26 }
  0x16   : > { %p177_p4 = scmp.eq.s32.totalorder %s1809_s13, 0  ;;  %s1261_s19 = sadd.s32 4294967295, %s1809_s13  }
  0x17   : > { %s43_s20 = sadd.s32 1, %s1805_s12  ;;  %s2300_s16 = smov (!%p37_p1, %s39_s16), %s1801_s11 }
  0x18   : > { %s1964_s21 = scalar_select %p167_p2, %s1773_s27, %s169_s18  }
  0x19   : > { %p41_p5 = scmp.ge.s32.totalorder %s2300_s16, 3  ;;  %p1966_p6 = por %p177_p4, %p176_p3 }
  0x1a   : > { %2260 = sst [smem:[#allocation9_spill]] %s1964_s21  ;;  %s2302_s15 = smov (%p37_p1, %s2298_s15), 0 }
  0x1b   : > { %2262 = sst [smem:[#allocation10_spill]] %s2302_s15  ;;  %s2304_s16 = smov (%p41_p5, %s2300_s16), 0 }
  0x1c   : > { %2263 = sst [smem:[#allocation11_spill]] %s2304_s16  ;;  %s2306_s20 = smov (!%p41_p5, %s43_s20), %s1805_s12 }
  0x1d   : > { %p237_p7 = scmp.ne.s32.totalorder %s1765_s25, %s1761_s24  ;;  %p45_p8 = scmp.ge.s32.totalorder %s2306_s20, 2 }
  0x1e   : > { %p238_p9 = scmp.eq.s32.totalorder %s1261_s19, 23  ;;  %s219_s23 = ssub.s32 %s1801_s11, %s2304_s16 }
  0x1f   : > { %s2308_s20 = smov (%p45_p8, %s2306_s20), 0  ;;  %s221_s18 = ssub.s32 %s1797_s10, %s2302_s15 }
  0x20   : > { %2264 = sst [smem:[#allocation12_spill]] %s2308_s20  ;;  %p1983_p10 = por %p238_p9, %p237_p7 }
  0x21   : > { %s218_s21 = ssub.s32 %s1805_s12, %s2308_s20  ;;  %s227_s2 = sadd.s32 1, %s1765_s25 }
  0x22   : > { %s220_s7 = sor.u32 %s219_s23, %s218_s21  ;;  %p1264_p12 = scmp.ge.s32.totalorder %s1809_s13, 24 }
  0x23   : > { %s222_s4 = sor.u32 %s221_s18, %s220_s7 }
  0x24   : > { %s224_s3 = sor.u32 %s222_s4, %s166_s17  ;;  %269 = sbr.rel (%p1264_p12) target bundleno = 67 (0x43), region = 28 }
  0x25   : > { %p225_p11 = scmp.eq.s32.totalorder %s224_s3, 0 }
  0x27   : > { %s1991_s6 = scalar_select %p225_p11, %s1765_s25, %s227_s2  }
  0x29   : > { %294 = sbr.rel (!%p1966_p6) target bundleno = 67 (0x43), region = 40  ;;  %s296_s19 = sand.u32 (%p1966_p6), 1, %s1773_s27  }
  0x2a   : > { %s1266_s16 = sshll.u32 (%p1966_p6), %s1793_s9, 2  ;;  %s1265_s15 = sshll.u32 (%p1966_p6), %s296_s19, 6 }
  0x2b   : > { %s2266_s5 = sld [smem:[#allocation17_spill]] (%p1966_p6)  ;;  %s298_s2 = scalar_lea.vmem (%p1966_p6), [#allocation4], %s1265_s15 }
  0x31   : > { %s2001_s7 = scalar_lea.vmem %s2266_s5, %s1266_s16 }
  0x32   : > { %v317_v0 = vld [vmem:[%s2001_s7] sm:$0xf]  ;;  %v319_v1 = vld [vmem:[%s2001_s7 + $0x8] sm:$0xf]  ;;  %v321_v2 = vld [vmem:[%s2001_s7 + $0x10] sm:$0xf] }
  0x33   : > { %318 = vst [vmem:[%s298_s2] sm:$0xf] %v317_v0  ;;  %v323_v3 = vld [vmem:[%s2001_s7 + $0x18] sm:$0xf]  ;;  %v325_v4 = vld [vmem:[%s2001_s7 + $0x20] sm:$0xf] }
  0x34   : > { %320 = vst [vmem:[%s298_s2 + $0x4] sm:$0xf] %v319_v1  ;;  %v327_v5 = vld [vmem:[%s2001_s7 + $0x28] sm:$0xf]  ;;  %v329_v6 = vld [vmem:[%s2001_s7 + $0x30] sm:$0xf] }
  0x35   : > { %322 = vst [vmem:[%s298_s2 + $0x8] sm:$0xf] %v321_v2  ;;  %v331_v7 = vld [vmem:[%s2001_s7 + $0x38] sm:$0xf]  ;;  %v333_v8 = vld [vmem:[%s2001_s7 + $0x40] sm:$0xf] }
  0x36   : > { %324 = vst [vmem:[%s298_s2 + $0xc] sm:$0xf] %v323_v3  ;;  %v335_v9 = vld [vmem:[%s2001_s7 + $0x48] sm:$0xf]  ;;  %v337_v10 = vld [vmem:[%s2001_s7 + $0x50] sm:$0xf] }
  0x37   : > { %326 = vst [vmem:[%s298_s2 + $0x10] sm:$0xf] %v325_v4  ;;  %v339_v11 = vld [vmem:[%s2001_s7 + $0x58] sm:$0xf]  ;;  %v341_v12 = vld [vmem:[%s2001_s7 + $0x60] sm:$0xf] }
  0x38   : > { %328 = vst [vmem:[%s298_s2 + $0x14] sm:$0xf] %v327_v5  ;;  %v343_v13 = vld [vmem:[%s2001_s7 + $0x68] sm:$0xf]  ;;  %v345_v14 = vld [vmem:[%s2001_s7 + $0x70] sm:$0xf] }
  0x39   : > { %330 = vst [vmem:[%s298_s2 + $0x18] sm:$0xf] %v329_v6  ;;  %v347_v15 = vld [vmem:[%s2001_s7 + $0x78] sm:$0xf] }
  0x3a   : > { %332 = vst [vmem:[%s298_s2 + $0x1c] sm:$0xf] %v331_v7 }
  0x3b   : > { %334 = vst [vmem:[%s298_s2 + $0x20] sm:$0xf] %v333_v8 }
  0x3c   : > { %336 = vst [vmem:[%s298_s2 + $0x24] sm:$0xf] %v335_v9 }
  0x3d   : > { %338 = vst [vmem:[%s298_s2 + $0x28] sm:$0xf] %v337_v10 }
  0x3e   : > { %340 = vst [vmem:[%s298_s2 + $0x2c] sm:$0xf] %v339_v11 }
  0x3f   : > { %342 = vst [vmem:[%s298_s2 + $0x30] sm:$0xf] %v341_v12 }
  0x40   : > { %344 = vst [vmem:[%s298_s2 + $0x34] sm:$0xf] %v343_v13 }
  0x41   : > { %346 = vst [vmem:[%s298_s2 + $0x38] sm:$0xf] %v345_v14 }
  0x42   : > { %348 = vst [vmem:[%s298_s2 + $0x3c] sm:$0xf] %v347_v15 }
  0x43 PF: > { %p1267_p13 = scmp.ge.s32.totalorder %s1809_s13, 1  ;;  %p409_p0 = scmp.lt.s32.totalorder %s1809_s13, 25 }
  0x45   : > { %p410_p1 = pnand %p1267_p13, %p409_p0 }
  0x46   : > { %s416_s3 = sand.u32 (!%p410_p1), 1, %s1769_s26   ;;  %s462_s4 = sand.u32 (!%p410_p1), 1, %s1761_s24  }
  0x47   : > { %413 = sbr.rel (%p410_p1) target bundleno = 669 (0x29d), region = 85  ;;  %s1268_s11 = sshll.u32 (!%p410_p1), %s416_s3, 6 }
  0x48   : > { %s1269_s15 = sshll.u32 (!%p410_p1), %s462_s4, 6  ;;  %p465_p2 = scmp.lt.s32.totalorder (!%p410_p1), %s1789_s8, 1 }
  0x49   : > { %p467_p3 = scmp.lt.s32.totalorder (!%p410_p1), %s1785_s30, 2  ;;  %p475_p4 = scmp.lt.s32.totalorder (!%p410_p1), %s1781_s29, 1 }
  0x4a   : > { %p481_p5 = scmp.lt.s32.totalorder (!%p410_p1), %s1777_s28, 1  ;;  %p489_p6 = scmp.eq.s32.totalorder (!%p410_p1), %s1781_s29, 0 }
  0x4b   : > { %s2267_s0 = sld [smem:[#allocation13_spill]] (!%p410_p1)  ;;  %p490_p7 = scmp.eq.s32.totalorder (!%p410_p1), %s1777_s28, 0 }
  0x4c   : > { %s466_s16 = scalar_select %p465_p2, %s1789_s8, 1 }
  0x4d   : > { %s468_s17 = scalar_select %p467_p3, %s1785_s30, 2 }
  0x4e   : > { %s1487_s20 = smul.u32 3, %s466_s16  ;;  %s1271_s21 = sshll.u32 %s466_s16, 1 }
  0x4f   : > { %s476_s22 = scalar_select %p475_p4, %s1781_s29, 1 }
  0x50   : > { %s470_s23 = sadd.s32 %s1487_s20, %s468_s17  ;;  %p491_p8 = pnand %p490_p7, %p489_p6 }
  0x51   : > { %s1270_s18 = sshll.u32 %s470_s23, 2  ;;  %s478_s19 = sadd.s32 %s1271_s21, %s476_s22 }
  0x52   : > { %s472_s7 = scalar_lea.vmem %s2267_s0, %s1270_s18  ;;  %s1272_s2 = sshll.u32 %s478_s19, 2 }
  0x53   : > { %s2037_s5 = scalar_lea.vmem %s2235_s1, %s1272_s2  ;;  %s2268_s20 = sld [smem:[#allocation18_spill]] }
  0x54   : > { %s2043_s12 = scalar_select %p481_p5, %s1777_s28, 1 }
  0x55   : > { %s2049_s22 = scalar_lea.vmem [#allocation4], %s1268_s11  ;;  %s2051_s23 = scalar_lea.vmem [#allocation5], %s1269_s15  }
  0x56   : > { %494 = sbr.rel (%p491_p8) target bundleno = 258 (0x102), region = 93  ;;  %s2269_s26 = sld [smem:[#allocation14_spill]] (!%p491_p8) }
  0x57   : > { %s2271_s11 = sld [smem:[#allocation15_spill]] (!%p491_p8) }
  0x59   : > { %s483_s21 = scalar_lea.vmem %s2268_s20, %s2043_s12 }
  0x5b   : > { %v495_v24 = vld [vmem:[%s472_s7] sm:$0xf] }
  0x5c   : > { %s2270_s3 = smov %s2269_s26  ;;  %v1416_v16 = vld [vmem:[%s2269_s26 + $0x38] sm:$0xff] }
  0x5d   : > { %564 = vmatpush.bf16.msra.mxu0 %v1416_v16  ;;  %v1415_v17 = vld [vmem:[%s2270_s3 + $0x30] sm:$0xff]  ;;  %v1414_v18 = vld [vmem:[%s2270_s3 + $0x28] sm:$0xff]  ;;  %v1413_v19 = vld [vmem:[%s2270_s3 + $0x20] sm:$0xff] }
  0x5e   : > { %v1412_v20 = vld [vmem:[%s2270_s3 + $0x18] sm:$0xff]  ;;  %v1411_v21 = vld [vmem:[%s2270_s3 + $0x10] sm:$0xff]  ;;  %v1410_v22 = vld [vmem:[%s2270_s3 + $0x8] sm:$0xff] }
  0x5f   : > { %v1409_v23 = vld [vmem:[%s2270_s3] sm:$0xff] }
  0x60   : > { %v1657_v25 = vld [vmem:[%s2271_s11] ss:$0 sm:$0xff] }
  0x61   : > { %565 = vmatpush.bf16.msra.mxu0 %v1415_v17 }
  0x65   : > { %566 = vmatpush.bf16.msra.mxu0 %v1414_v18 }
  0x69   : > { %567 = vmatpush.bf16.msra.mxu0 %v1413_v19 }
  0x6d   : > { %568 = vmatpush.bf16.msra.mxu0 %v1412_v20 }
  0x71   : > { %569 = vmatpush.bf16.msra.mxu0 %v1411_v21 }
  0x75   : > { %570 = vmatpush.bf16.msra.mxu0 %v1410_v22 }
  0x79   : > { %571 = vmatpush.bf16.msra.mxu0 %v1409_v23 }
  0x7c   : > { %572 = vmatmul.bf16.vlgmr.msra.gmra.mxu0 %v495_v24 }
  0xf9   : > { %v573_v26 = vpop.f32.mrf.mxu0 }
  0xfa   : > { %v574_v27 = vadd.f32 %v1657_v25, %v573_v26 }
  0xfc   : > { %v577_v28 = vpack.c.bf16 %v574_v27, %v574_v27 }
  0xfe   : > { %578 = vst [vmem:[#allocation2] sm:$0xf] %v577_v28 }
 0x101   : > { %v575_v29 = vpop.f32.mrf.mxu0 }
 0x102 PF: > { %p1305_p9 = scmp.ne.s32.totalorder %s1777_s28, 0 }
 0x103   : > { %s2272_s17 = sld [smem:[#allocation16_spill]] (!%p1305_p9) }
 0x104   : > { %581 = sbr.rel (%p1305_p9) target bundleno = 450 (0x1c2), region = 97 }
 0x109   : > { %v1424_v30 = vld [vmem:[%s2272_s17 + $0x38] sm:$0xff]  ;;  %v1423_v31 = vld [vmem:[%s2272_s17 + $0x30] sm:$0xff]  ;;  %v1422_v32 = vld [vmem:[%s2272_s17 + $0x28] sm:$0xff]  ;;  %vm669_vm0 = vcmask 1041409   ;;  %vm673_vm1 = vcmask 1042434   ;;  %vm677_vm2 = vcmask 1043459  }
 0x10a   : > { %647 = vmatpush.bf16.msra.mxu0 %v1424_v30  ;;  %v1421_v33 = vld [vmem:[%s2272_s17 + $0x20] sm:$0xff]  ;;  %v1420_v34 = vld [vmem:[%s2272_s17 + $0x18] sm:$0xff]  ;;  %v1419_v35 = vld [vmem:[%s2272_s17 + $0x10] sm:$0xff]  ;;  %vm664_vm3 = vcmask 1040384  }
 0x10b   : > { %v1418_v36 = vld [vmem:[%s2272_s17 + $0x8] sm:$0xff]  ;;  %v1417_v37 = vld [vmem:[%s2272_s17] sm:$0xff] }
 0x10c   : > { %v582_v38 = vld [vmem:[%s2037_s5] sm:$0xf] }
 0x10d   : > { %v661_v39 = vld [vmem:[#allocation2] sm:$0xf] }
 0x10e   : > { %648 = vmatpush.bf16.msra.mxu0 %v1423_v31  ;;  %v663_v40 = vrot.slane %v661_v39, 3 }
 0x110   : > { %v670_v41 = vsel %vm669_vm0, %v661_v39, %v663_v40  ;;  %v674_v42 = vsel %vm673_vm1, %v661_v39, %v663_v40  ;;  %v678_v43 = vsel %vm677_vm2, %v661_v39, %v663_v40  ;;  %v667_v45 = vsel %vm664_vm3, %v661_v39, %v663_v40 }
 0x111   : > { %v672_v44 = vrot.slane %v670_v41, 1  ;;  %v676_v46 = vrot.slane %v674_v42, 2  ;;  %v680_v47 = vrot.slane %v678_v43, 3  ;;  %v682_v48 = vunpack.i.h.s16 %v667_v45 }
 0x112   : > { %649 = vmatpush.bf16.msra.mxu0 %v1422_v32  ;;  %v1338_v52 = vpack.i.b16 %v667_v45, %v667_v45 }
 0x113   : > { %v684_v49 = vunpack.i.h.s16 %v672_v44  ;;  %v686_v50 = vunpack.i.h.s16 %v676_v46  ;;  %v688_v51 = vunpack.i.h.s16 %v680_v47  ;;  %v690_v53 = vpack.i.b16 %v682_v48, %v682_v48 }
 0x114   : > { %v1339_v54 = vpack.i.b16 %v672_v44, %v672_v44  ;;  %v1340_v56 = vpack.i.b16 %v676_v46, %v676_v46  ;;  %v1341_v58 = vpack.i.b16 %v680_v47, %v680_v47  ;;  %v697_v60 = vperm.slane %v1338_v52, 0 }
 0x115   : > { %v692_v55 = vpack.i.b16 %v684_v49, %v684_v49  ;;  %v694_v57 = vpack.i.b16 %v686_v50, %v686_v50  ;;  %v696_v59 = vpack.i.b16 %v688_v51, %v688_v51  ;;  %v698_v61 = vperm.slane %v690_v53, 0 }
 0x116   : > { %650 = vmatpush.bf16.msra.mxu0 %v1421_v33  ;;  %v699_v62 = vperm.slane %v1339_v54, 0  ;;  %v701_v0 = vperm.slane %v1340_v56, 0  ;;  %v703_v2 = vperm.slane %v1341_v58, 0  ;;  %v706_v4 = vpack.i.b16 %v697_v60, %v697_v60 }
 0x117   : > { %v700_v63 = vperm.slane %v692_v55, 0  ;;  %v702_v1 = vperm.slane %v694_v57, 0  ;;  %v704_v3 = vperm.slane %v696_v59, 0  ;;  %v710_v5 = vpack.i.b16 %v698_v61, %v698_v61 }
 0x118   : > { %v714_v6 = vpack.i.b16 %v699_v62, %v699_v62  ;;  %v722_v8 = vpack.i.b16 %v701_v0, %v701_v0  ;;  %v730_v10 = vpack.i.b16 %v703_v2, %v703_v2  ;;  %v708_v12 = vperm.slane %v706_v4, 0 }
 0x119   : > { %v718_v7 = vpack.i.b16 %v700_v63, %v700_v63  ;;  %v726_v9 = vpack.i.b16 %v702_v1, %v702_v1  ;;  %v734_v11 = vpack.i.b16 %v704_v3, %v704_v3  ;;  %v712_v13 = vperm.slane %v710_v5, 0 }
 0x11a   : > { %651 = vmatpush.bf16.msra.mxu0 %v1420_v34  ;;  %v716_v14 = vperm.slane %v714_v6, 0  ;;  %v724_v16 = vperm.slane %v722_v8, 0  ;;  %v732_v18 = vperm.slane %v730_v10, 0  ;;  %v737_v21 = vunpack.c.l.bf16 %v708_v12 }
 0x11b   : > { %v720_v15 = vperm.slane %v718_v7, 0  ;;  %v728_v17 = vperm.slane %v726_v9, 0  ;;  %v736_v19 = vperm.slane %v734_v11, 0  ;;  %v738_v23 = vunpack.c.l.bf16 %v712_v13 }
 0x11c   : > { %v739_v24 = vunpack.c.l.bf16 %v716_v14  ;;  %v741_v26 = vunpack.c.l.bf16 %v724_v16  ;;  %v743_v28 = vunpack.c.l.bf16 %v732_v18 }
 0x11d   : > { %v740_v25 = vunpack.c.l.bf16 %v720_v15  ;;  %v742_v27 = vunpack.c.l.bf16 %v728_v17  ;;  %v744_v29 = vunpack.c.l.bf16 %v736_v19 }
 0x11e   : > { %652 = vmatpush.bf16.msra.mxu0 %v1419_v35 }
 0x122   : > { %653 = vmatpush.bf16.msra.mxu0 %v1418_v36 }
 0x126   : > { %654 = vmatpush.bf16.msra.mxu0 %v1417_v37 }
 0x129   : > { %655 = vmatmul.bf16.vlgmr.msra.gmra.mxu0 %v582_v38 }
 0x1a6   : > { %v656_v20 = vpop.f32.mrf.mxu0 }
 0x1a7   : > { %v660_v22 = vpack.c.bf16 %v656_v20, %v656_v20 }
 0x1a9   : > { %v745_v30 = vunpack.c.l.bf16 %v660_v22 }
 0x1ab   : > { %v746_v31 = vadd.f32 %v745_v30, %v737_v21  ;;  %v747_v32 = vadd.f32 %v745_v30, %v738_v23  ;;  %v748_v33 = vadd.f32 %v745_v30, %v739_v24  ;;  %v749_v34 = vadd.f32 %v745_v30, %v740_v25 }
 0x1ac   : > { %v750_v35 = vadd.f32 %v745_v30, %v741_v26  ;;  %v751_v36 = vadd.f32 %v745_v30, %v742_v27  ;;  %v752_v37 = vadd.f32 %v745_v30, %v743_v28  ;;  %v753_v38 = vadd.f32 %v745_v30, %v744_v29 }
 0x1ad   : > { %v754_v39 = vpack.c.bf16 %v746_v31, %v746_v31  ;;  %v755_v40 = vpack.c.bf16 %v747_v32, %v747_v32  ;;  %v756_v41 = vpack.c.bf16 %v748_v33, %v748_v33  ;;  %v757_v42 = vpack.c.bf16 %v749_v34, %v749_v34 }
 0x1ae   : > { %v758_v43 = vpack.c.bf16 %v750_v35, %v750_v35  ;;  %v759_v44 = vpack.c.bf16 %v751_v36, %v751_v36  ;;  %v658_v45 = vpop.f32.mrf.mxu0  ;;  %v760_v46 = vpack.c.bf16 %v752_v37, %v752_v37  ;;  %v761_v50 = vpack.c.bf16 %v753_v38, %v753_v38 }
 0x1af   : > { %v762_v47 = vunpack.c.l.bf16 %v754_v39  ;;  %v763_v48 = vunpack.c.l.bf16 %v755_v40  ;;  %v764_v49 = vunpack.c.l.bf16 %v756_v41  ;;  %v765_v51 = vunpack.c.l.bf16 %v757_v42 }
 0x1b0   : > { %v766_v52 = vunpack.c.l.bf16 %v758_v43  ;;  %v767_v53 = vunpack.c.l.bf16 %v759_v44  ;;  %v768_v54 = vunpack.c.l.bf16 %v760_v46  ;;  %v769_v55 = vunpack.c.l.bf16 %v761_v50 }
 0x1b1   : > { %1658 = vtanh.f32 %v762_v47 }
 0x1b2   : > { %1660 = vtanh.f32 %v763_v48 }
 0x1b3   : > { %1662 = vtanh.f32 %v764_v49 }
 0x1b4   : > { %1664 = vtanh.f32 %v765_v51 }
 0x1b5   : > { %1666 = vtanh.f32 %v766_v52 }
 0x1b6   : > { %1668 = vtanh.f32 %v767_v53 }
 0x1b7   : > { %v1659_v56 = vpop.eup %1658  ;;  %1670 = vtanh.f32 %v768_v54 }
 0x1b8   : > { %v1661_v57 = vpop.eup %1660  ;;  %1672 = vtanh.f32 %v769_v55 }
 0x1b9   : > { %v1663_v58 = vpop.eup %1662  ;;  %v1443_v59 = vpack.c.bf16 %v1661_v57, %v1659_v56 }
 0x1ba   : > { %v1665_v60 = vpop.eup %1664 }
 0x1bb   : > { %v1667_v61 = vpop.eup %1666  ;;  %1444 = vst [vmem:[#allocation3 + $0x10] sm:$0xff] %v1443_v59   ;;  %v1448_v62 = vpack.c.bf16 %v1665_v60, %v1663_v58 }
 0x1bc   : > { %v1669_v63 = vpop.eup %1668 }
 0x1bd   : > { %v1671_v0 = vpop.eup %1670  ;;  %1460 = vst [vmem:[#allocation3] sm:$0xff] %v1448_v62   ;;  %v1453_v1 = vpack.c.bf16 %v1669_v63, %v1667_v61 }
 0x1be   : > { %v1673_v2 = vpop.eup %1672 }
 0x1bf   : > { %1461 = vst [vmem:[#allocation3 + $0x18] sm:$0xff] %v1453_v1   ;;  %v1458_v3 = vpack.c.bf16 %v1673_v2, %v1671_v0 }
 0x1c1   : > { %1462 = vst [vmem:[#allocation3 + $0x8] sm:$0xff] %v1458_v3  }
 0x1c2 PF: > { %v1436_v4 = vld [vmem:[%s2049_s22 + $0x38] sm:$0xff]  ;;  %v1435_v5 = vld [vmem:[%s2049_s22 + $0x30] sm:$0xff]  ;;  %v1434_v6 = vld [vmem:[%s2049_s22 + $0x28] sm:$0xff]  ;;  %s1391_s12 = sshll.u32 (%p1983_p10), %s1785_s30, 3  ;;  %s1437_s0 = sshll.u32 (%p1983_p10), %s1785_s30, 5 }
 0x1c3   : > { %894 = vmatpush.bf16.msra.mxu0 %v1436_v4  ;;  %1463 = vmatpush.bf16.msra.mxu1 %v1436_v4  ;;  %v1433_v7 = vld [vmem:[%s2049_s22 + $0x20] sm:$0xff]  ;;  %v1432_v8 = vld [vmem:[%s2049_s22 + $0x18] sm:$0xff]  ;;  %v1431_v9 = vld [vmem:[%s2049_s22 + $0x10] sm:$0xff]  ;;  %s1488_s2 = smul.u32 (%p1983_p10), 80, %s1789_s8  ;;  %s2274_s7 = sld [smem:[#allocation19_spill]] (%p1983_p10) }
 0x1c4   : > { %1464 = vmatpush.bf16.msra.mxu2 %v1436_v4  ;;  %1465 = vmatpush.bf16.msra.mxu3 %v1436_v4  ;;  %v1430_v10 = vld [vmem:[%s2049_s22 + $0x8] sm:$0xff]  ;;  %v1429_v11 = vld [vmem:[%s2049_s22] sm:$0xff]  ;;  %v1425_v12 = vld [vmem:[#allocation3 + $0x10] sm:$0xff]  ;;  %s939_s22 = ssub.s32 (%p1983_p10), 20, %s1391_s12 }
 0x1c5   : > { %v1426_v13 = vld [vmem:[#allocation3] sm:$0xff]  ;;  %v1674_v16 = vld [vmem:[%s483_s21] ss:$0 sm:$0xff]  ;;  %s1394_s21 = sshll.u32 (%p1983_p10), %s1781_s29, 1  ;;  %p940_p11 = scmp.lt.s32.totalorder (%p1983_p10), %s939_s22, 8 }
 0x1c6   : > { %v1427_v14 = vld [vmem:[#allocation3 + $0x18] sm:$0xff]  ;;  %s945_s26 = sadd.s32 (%p1983_p10), %s1777_s28, %s1394_s21 }
 0x1c7   : > { %895 = vmatpush.bf16.msra.mxu0 %v1435_v5  ;;  %1466 = vmatpush.bf16.msra.mxu1 %v1435_v5  ;;  %s947_s24 = sadd.s32 (%p1983_p10), %s1437_s0, %s945_s26 }
 0x1c8   : > { %1467 = vmatpush.bf16.msra.mxu2 %v1435_v5  ;;  %1468 = vmatpush.bf16.msra.mxu3 %v1435_v5  ;;  %v1428_v15 = vld [vmem:[#allocation3 + $0x8] sm:$0xff]  ;;  %s949_s4 = sadd.s32 (%p1983_p10), %s1488_s2, %s947_s24 }
 0x1c9   : > { %s1396_s14 = sshll.u32 (%p1983_p10), %s949_s4, 3 }
 0x1ca   : > { %s2140_s20 = scalar_lea.vmem (%p1983_p10), %s2274_s7, %s1396_s14  }
 0x1cb   : > { %896 = vmatpush.bf16.msra.mxu0 %v1434_v6  ;;  %1469 = vmatpush.bf16.msra.mxu1 %v1434_v6 }
 0x1cc   : > { %1470 = vmatpush.bf16.msra.mxu2 %v1434_v6  ;;  %1471 = vmatpush.bf16.msra.mxu3 %v1434_v6 }
 0x1cf   : > { %897 = vmatpush.bf16.msra.mxu0 %v1433_v7  ;;  %1472 = vmatpush.bf16.msra.mxu1 %v1433_v7 }
 0x1d0   : > { %1473 = vmatpush.bf16.msra.mxu2 %v1433_v7  ;;  %1474 = vmatpush.bf16.msra.mxu3 %v1433_v7 }
 0x1d3   : > { %898 = vmatpush.bf16.msra.mxu0 %v1432_v8  ;;  %1475 = vmatpush.bf16.msra.mxu1 %v1432_v8 }
 0x1d4   : > { %1476 = vmatpush.bf16.msra.mxu2 %v1432_v8  ;;  %1477 = vmatpush.bf16.msra.mxu3 %v1432_v8 }
 0x1d7   : > { %899 = vmatpush.bf16.msra.mxu0 %v1431_v9  ;;  %1478 = vmatpush.bf16.msra.mxu1 %v1431_v9 }
 0x1d8   : > { %1479 = vmatpush.bf16.msra.mxu2 %v1431_v9  ;;  %1480 = vmatpush.bf16.msra.mxu3 %v1431_v9 }
 0x1db   : > { %900 = vmatpush.bf16.msra.mxu0 %v1430_v10  ;;  %1481 = vmatpush.bf16.msra.mxu1 %v1430_v10 }
 0x1dc   : > { %1482 = vmatpush.bf16.msra.mxu2 %v1430_v10  ;;  %1483 = vmatpush.bf16.msra.mxu3 %v1430_v10 }
 0x1df   : > { %901 = vmatpush.bf16.msra.mxu0 %v1429_v11  ;;  %1484 = vmatpush.bf16.msra.mxu1 %v1429_v11 }
 0x1e0   : > { %1485 = vmatpush.bf16.msra.mxu2 %v1429_v11  ;;  %1486 = vmatpush.bf16.msra.mxu3 %v1429_v11 }
 0x1e2   : > { %902 = vmatmul.bf16.vlgmr.msra.gmra.mxu0 %v1425_v12  ;;  %907 = vmatmul.bf16.vlgmr.msra.gmra.mxu1 %v1426_v13 }
 0x1e3   : > { %912 = vmatmul.bf16.vlgmr.msra.gmra.mxu2 %v1427_v14  ;;  %917 = vmatmul.bf16.vlgmr.msra.gmra.mxu3 %v1428_v15 }
 0x25f   : > { %v903_v17 = vpop.f32.mrf.mxu0  ;;  %v908_v18 = vpop.f32.mrf.mxu1 }
 0x260   : > { %v904_v19 = vadd.f32 %v1674_v16, %v903_v17  ;;  %v909_v20 = vadd.f32 %v1674_v16, %v908_v18 }
 0x262   : > { %923 = vst [vmem:[%s2051_s23] sm:$0xff] %v904_v19 }
 0x263   : > { %925 = vst [vmem:[%s2051_s23 + $0x10] sm:$0xff] %v909_v20 }
 0x266   : > { %v913_v21 = vpop.f32.mrf.mxu2  ;;  %v918_v22 = vpop.f32.mrf.mxu3 }
 0x267   : > { %v914_v23 = vadd.f32 %v1674_v16, %v913_v21  ;;  %v919_v24 = vadd.f32 %v1674_v16, %v918_v22  ;;  %v905_v25 = vpop.f32.mrf.mxu0  ;;  %v910_v26 = vpop.f32.mrf.mxu1 }
 0x268   : > { %v906_v27 = vadd.f32 %v1674_v16, %v905_v25  ;;  %v911_v28 = vadd.f32 %v1674_v16, %v910_v26 }
 0x269   : > { %927 = vst [vmem:[%s2051_s23 + $0x20] sm:$0xff] %v914_v23 }
 0x26a   : > { %929 = vst [vmem:[%s2051_s23 + $0x30] sm:$0xff] %v919_v24 }
 0x26b   : > { %924 = vst [vmem:[%s2051_s23 + $0x8] sm:$0xff] %v906_v27 }
 0x26c   : > { %926 = vst [vmem:[%s2051_s23 + $0x18] sm:$0xff] %v911_v28 }
 0x26e   : > { %v915_v29 = vpop.f32.mrf.mxu2  ;;  %v920_v30 = vpop.f32.mrf.mxu3  ;;  %937 = sbr.rel (!%p1983_p10) target bundleno = 669 (0x29d), region = 101 }
 0x26f   : > { %v916_v31 = vadd.f32 %v1674_v16, %v915_v29  ;;  %v921_v32 = vadd.f32 %v1674_v16, %v920_v30 }
 0x271   : > { %928 = vst [vmem:[%s2051_s23 + $0x28] sm:$0xff] %v916_v31 }
 0x272   : > { %930 = vst [vmem:[%s2051_s23 + $0x38] sm:$0xff] %v921_v32 }
 0x273   : > { %s2310_s22 = smov (!%p940_p11, %s939_s22), 8 }
 0x274   : > { %s1392_s11 = sshll.u32 %s2310_s22, 3 }
 0x275   : > { %p1397_p10 = scmp.eq.s32.totalorder %s1392_s11, 0 }
 0x276   : > { %s2143_s29 = sshrl.u32 (!%p1397_p10), %s2310_s22, 3 }
 0x277   : > { %954 = sbr.rel (%p1397_p10) target bundleno = 669 (0x29d), region = 105  ;;  %p1398_p12 = scmp.le.s32.totalorder (!%p1397_p10), %s2143_s29, 0 }
 0x27c   : > { %1176 = sbr.rel (%p1398_p12) target bundleno = 652 (0x28c), region = 195  ;;  %s2275_s28 = smov (!%p1398_p12), %s2140_s20 }
 0x27d   : > { %s2276_s30 = smov (!%p1398_p12), %s2051_s23  ;;  %s2152_s8 = smov (!%p1398_p12), 0  }
 0x27e   : > { %s2154_s5 = smov (!%p1398_p12), 0  }
 0x281 LB: >> { %v1031_v33 = vld [vmem:[%s1817_s30] sm:$0xff]  ;;  %v1033_v34 = vld [vmem:[%s1817_s30 + $0x8] sm:$0xff]  ;;  %v1035_v35 = vld [vmem:[%s1817_s30 + $0x10] sm:$0xff]  ;;  %s1047_s18 = sadd.s32 1, %s1821_s8  ;;  %s1025_s5 = sadd.s32 1, %s1825_s5   ;;  %s1825_s5 = sphi %s2154_s5, %s1025_s5   ;;  %s1821_s8 = sphi %s2152_s8, %s2278_s8   ;;  %s1817_s30 = sphi %s2276_s30, %s1052_s30   ;;  %s1813_s28 = sphi %s2275_s28, %s2277_s28  }
 0x282   : >> { %1032 = vst [vmem:[%s1813_s28] sm:$0xff] %v1031_v33  ;;  %v1037_v36 = vld [vmem:[%s1817_s30 + $0x18] sm:$0xff]  ;;  %p1048_p13 = scmp.ge.s32.totalorder %s1047_s18, %s2143_s29  ;;  %v1039_v37 = vld [vmem:[%s1817_s30 + $0x20] sm:$0xff]  ;;  %v1041_v38 = vld [vmem:[%s1817_s30 + $0x28] sm:$0xff]  ;;  %p1024_p0 = scmp.ge.s32.totalorder %s1025_s5, %s2143_s29 }
 0x283   : >> { %1034 = vst [vmem:[%s1813_s28 + $0x20] sm:$0xff] %v1033_v34  ;;  %v1043_v39 = vld [vmem:[%s1817_s30 + $0x30] sm:$0xff]  ;;  %v1045_v40 = vld [vmem:[%s1817_s30 + $0x38] sm:$0xff] }
 0x284   : >> { %1036 = vst [vmem:[%s1813_s28 + $0x40] sm:$0xff] %v1035_v35  ;;  %s2312_s18 = smov (%p1048_p13, %s1047_s18), 0 }
 0x285   : >> { %1038 = vst [vmem:[%s1813_s28 + $0x60] sm:$0xff] %v1037_v36  ;;  %s1399_s19 = sshll.u32 %s2312_s18, 6  ;;  %s1400_s12 = sshll.u32 %s2312_s18, 8 }
 0x286   : >> { %1040 = vst [vmem:[%s1813_s28 + $0x80] sm:$0xff] %v1039_v37  ;;  %s1052_s30 = scalar_lea.vmem %s2051_s23, %s1399_s19 [#allocation5]   ;;  %s1053_s21 = scalar_lea.vmem %s2140_s20, %s1400_s12  }
 0x287   : >> { %1042 = vst [vmem:[%s1813_s28 + $0xa0] sm:$0xff] %v1041_v38  ;;  %s2278_s8 = smov %s2312_s18  ;;  %1027 = sbr.rel (!%p1024_p0) target bundleno = 641 (0x281), region = 201 }
 0x288   : >> { %1044 = vst [vmem:[%s1813_s28 + $0xc0] sm:$0xff] %v1043_v39 }
 0x289   : >> { %1046 = vst [vmem:[%s1813_s28 + $0xe0] sm:$0xff] %v1045_v40  ;;  %s2277_s28 = smov %s1053_s21 }
 0x28c PF: > { %s2176_s26 = sand.u32 7, %s2310_s22   ;;  %s1438_s0 = sshll.u32 %s2143_s29, 6 }
 0x28d   : > { %s2180_s24 = scalar_lea.vmem %s2051_s23, %s1438_s0 [#allocation5]   ;;  %s1439_s2 = sshll.u32 %s2143_s29, 8 }
 0x28e   : > { %s1060_s4 = scalar_lea.vmem %s2140_s20, %s1439_s2   ;;  %p1404_p1 = scmp.le.s32.totalorder %s2176_s26, 0 }
 0x28f   : > { %s1827_s11 = smov (!%p1404_p1), %s1060_s4   ;;  %s1831_s14 = smov (!%p1404_p1), %s2180_s24  }
 0x290   : > { %1190 = sbr.rel (%p1404_p1) target bundleno = 669 (0x29d), region = 206  ;;  %s1835_s16 = smov (!%p1404_p1), 0  }
 0x291   : > { %s1839_s15 = smov (!%p1404_p1), 0  }
 0x295 LB: >> { %v1070_v41 = vld [vmem:[%s1833_s14] sm:$0xff]  ;;  %s1072_s23 = sadd.s32 1, %s1837_s16  ;;  %s1064_s15 = sadd.s32 1, %s1841_s15   ;;  %s1841_s15 = sphi %s1839_s15, %s1064_s15   ;;  %s1837_s16 = sphi %s1835_s16, %s1836_s16   ;;  %s1833_s14 = sphi %s1831_s14, %s1077_s14   ;;  %s1829_s11 = sphi %s1827_s11, %s1078_s11  }
 0x296   : >> { %1071 = vst [vmem:[%s1829_s11] sm:$0xff] %v1070_v41  ;;  %p1073_p2 = scmp.ge.s32.totalorder %s1072_s23, %s2176_s26  ;;  %p1063_p3 = scmp.ge.s32.totalorder %s1064_s15, %s2176_s26 }
 0x298   : >> { %s2314_s23 = smov (%p1073_p2, %s1072_s23), 0  ;;  %1066 = sbr.rel (!%p1063_p3) target bundleno = 661 (0x295), region = 212 }
 0x299   : >> { %s1405_s22 = sshll.u32 %s2314_s23, 3  ;;  %s1406_s7 = sshll.u32 %s2314_s23, 5 }
 0x29a   : >> { %s1077_s14 = scalar_lea.vmem %s2180_s24, %s1405_s22 [#allocation5]   ;;  %s1078_s11 = scalar_lea.vmem %s1060_s4, %s1406_s7  }
 0x29b   : >> { %s1836_s16 = smov %s2314_s23  }
 0x29d PF: > { %s17_s13 = sadd.s32 1, %s1809_s13   ;;  %s2280_s29 = sld [smem:[#allocation9_spill]] }
 0x29e   : > { %p2190_p4 = scmp.ge.s32.totalorder %s17_s13, 26   ;;  %s2281_s30 = sld [smem:[#allocation6_spill]] }
 0x29f   : > { %s2282_s8 = sld [smem:[#allocation7_spill]]  ;;  %s2287_s24 = smov %s1765_s25 }
 0x2a0   : > { %s2283_s5 = sld [smem:[#allocation8_spill]]  ;;  %s2288_s25 = smov %s1991_s6 }
 0x2a1   : > { %s2284_s18 = sld [smem:[#allocation10_spill]]  ;;  %s2289_s26 = smov %s1773_s27 }
 0x2a2   : > { %s2285_s11 = sld [smem:[#allocation11_spill]]  ;;  %s2291_s28 = smov %s1793_s9 }
 0x2a3   : > { %s2286_s12 = sld [smem:[#allocation12_spill]]  ;;  %s2290_s27 = smov %s2280_s29 }
 0x2a4   : > { %s2292_s29 = smov %s1797_s10  ;;  %16 = sbr.rel (!%p2190_p4) target bundleno = 15 (0xf), region = 223 }
 0x2a6   : > { %s2293_s9 = smov %s2283_s5 }
 0x2a7   : > { %s2294_s10 = smov %s2284_s18 }

</bundles_post_ra>
